<compile_context>
chip_gen: v7x
topology: tpu7x:2x2x1
jax: 0.10.0
libtpu: 0.0.40
codegen_flags: <defaults>
</compile_context>

<pallas_src>
import functools

import jax
import jax.numpy as jnp
from jax.experimental import pallas as pl
from jax.experimental.pallas import tpu as pltpu

HIDDEN = 256


def _pick_block_b(B):
    """grid=2 (batch split across v7x's two TCs) when the batch is big enough
    and the half-tile stays sublane-aligned; otherwise one full-batch block."""
    if B >= 256 and B % 16 == 0:
        return B // 2          # grid = 2
    return B                   # grid = 1 (block == full array dim, always legal)


def actor_kernel(x_ref, w1_ref, b1_ref, w2_ref, b2_ref, w3_ref, b3_ref, o_ref,
                 *, max_action):
    # In-kernel bf16 cast of the state tile (hidden under the layer-1 matmul).
    x = x_ref[...].astype(jnp.bfloat16)
    # Layer 1: bf16 (tb, S) @ bf16 (S, 256) -> f32 acc -> +bias -> relu
    h1 = jnp.dot(x, w1_ref[...], preferred_element_type=jnp.float32) + b1_ref[...]
    h1 = jnp.maximum(h1, 0.0).astype(jnp.bfloat16)
    # Layer 2: (tb, 256) @ (256, 256)
    h2 = jnp.dot(h1, w2_ref[...], preferred_element_type=jnp.float32) + b2_ref[...]
    h2 = jnp.maximum(h2, 0.0).astype(jnp.bfloat16)
    # Layer 3: (tb, 256) @ (256, A) -> max_action * tanh (f32 on VPU/EUP)
    a = jnp.dot(h2, w3_ref[...], preferred_element_type=jnp.float32) + b3_ref[...]
    o_ref[...] = (max_action * jnp.tanh(a)).astype(o_ref.dtype)


def prepare_params(params):
    """One-time weight preparation: bf16 MXU operands, f32 biases.
    Call once outside the training/inference loop."""
    w1, b1, w2, b2, w3, b3 = params
    return (w1.astype(jnp.bfloat16), b1.astype(jnp.float32),
            w2.astype(jnp.bfloat16), b2.astype(jnp.float32),
            w3.astype(jnp.bfloat16), b3.astype(jnp.float32))


@functools.partial(jax.jit, static_argnames=("max_action",))
def actor_forward(state, prepared, max_action):
    """state: (B, state_dim) float32. Returns (B, action_dim) float32."""
    w1b, b1f, w2b, b2f, w3b, b3f = prepared
    B, S = state.shape
    A = w3b.shape[1]

    block_b = _pick_block_b(B)
    assert B % block_b == 0

    kernel = functools.partial(actor_kernel, max_action=float(max_action))

    def const(shape):
        # Constant index_map: block is resident across the whole grid.
        return pl.BlockSpec(shape, lambda i: (0,) * len(shape))

    return pl.pallas_call(
        kernel,
        out_shape=jax.ShapeDtypeStruct((B, A), jnp.float32),
        grid_spec=pltpu.PrefetchScalarGridSpec(
            num_scalar_prefetch=0,
            grid=(B // block_b,),
            in_specs=[
                pl.BlockSpec((block_b, S), lambda i: (i, 0)),   # state tile (f32)
                const((S, HIDDEN)),                             # w1 (bf16)
                const((1, HIDDEN)),                             # b1 (f32)
                const((HIDDEN, HIDDEN)),                        # w2 (bf16)
                const((1, HIDDEN)),                             # b2 (f32)
                const((HIDDEN, A)),                             # w3 (bf16)
                const((1, A)),                                  # b3 (f32)
            ],
            # Last block dim equals the full array dim (A), so this layout is
            # legal; stores are masked on A<128 lanes but writeback is minimal.
            out_specs=pl.BlockSpec((block_b, A), lambda i: (i, 0)),
        ),
        compiler_params=pltpu.CompilerParams(
            dimension_semantics=("parallel",)),
    )(state, w1b, b1f, w2b, b2f, w3b, b3f)


def init_actor_params(key, state_dim, action_dim):
    """Deterministic init mimicking PyTorch nn.Linear default
    (U[-1/sqrt(fan_in), 1/sqrt(fan_in)]). Weights stored as (in, out)."""
    ks = jax.random.split(key, 6)

    def linear(kw, kb, fan_in, fan_out):
        bound = 1.0 / jnp.sqrt(jnp.float32(fan_in))
        w = jax.random.uniform(kw, (fan_in, fan_out), jnp.float32, -bound, bound)
        b = jax.random.uniform(kb, (1, fan_out), jnp.float32, -bound, bound)
        return w, b

    w1, b1 = linear(ks[0], ks[1], state_dim, HIDDEN)
    w2, b2 = linear(ks[2], ks[3], HIDDEN, HIDDEN)
    w3, b3 = linear(ks[4], ks[5], HIDDEN, action_dim)
    return (w1, b1, w2, b2, w3, b3)


def actor_reference_f32(state, params, max_action):
    w1, b1, w2, b2, w3, b3 = params
    h1 = jnp.maximum(state @ w1 + b1, 0.0)
    h2 = jnp.maximum(h1 @ w2 + b2, 0.0)
    return max_action * jnp.tanh(h2 @ w3 + b3)


def actor_reference_bf16(state, params, max_action):
    """Reference mirroring the kernel's bf16-operand / f32-accumulate math."""
    w1, b1, w2, b2, w3, b3 = params
    x = state.astype(jnp.bfloat16)
    h1 = jnp.dot(x, w1.astype(jnp.bfloat16),
                 preferred_element_type=jnp.float32) + b1
    h1 = jnp.maximum(h1, 0.0).astype(jnp.bfloat16)
    h2 = jnp.dot(h1, w2.astype(jnp.bfloat16),
                 preferred_element_type=jnp.float32) + b2
    h2 = jnp.maximum(h2, 0.0).astype(jnp.bfloat16)
    a = jnp.dot(h2, w3.astype(jnp.bfloat16),
                preferred_element_type=jnp.float32) + b3
    return max_action * jnp.tanh(a)


if __name__ == "__main__":
    STATE_DIM = 16   # state_dim[0]
    ACTION_DIM = 4   # action_dim[0]
    MAX_ACTION = 2.0

    key = jax.random.PRNGKey(0)
    k_params, k_small, k_large = jax.random.split(key, 3)
    params = init_actor_params(k_params, STATE_DIM, ACTION_DIM)
    prepared = prepare_params(params)   # one-time bf16/f32 weight prep

    # --- small inference-style batch (grid=1, full-batch block) ---
    B_small = 8
    state_s = jax.random.normal(k_small, (B_small, STATE_DIM), dtype=jnp.float32)
    out_s = jax.block_until_ready(actor_forward(state_s, prepared, MAX_ACTION))
    assert out_s.shape == (B_small, ACTION_DIM)
    ref_s_bf16 = actor_reference_bf16(state_s, params, MAX_ACTION)
    ref_s_f32 = actor_reference_f32(state_s, params, MAX_ACTION)
    assert jnp.allclose(out_s, ref_s_bf16, atol=1e-2, rtol=1e-2), "mismatch vs bf16 reference"
    assert jnp.allclose(out_s, ref_s_f32, atol=1e-1, rtol=1e-1), "mismatch vs f32 reference"

    # --- larger batch: exercises block_b=B/2, grid=2 (2-core shard on v7x) ---
    B_large = 512
    state_l = jax.random.normal(k_large, (B_large, STATE_DIM), dtype=jnp.float32)
    out_l = jax.block_until_ready(actor_forward(state_l, prepared, MAX_ACTION))
    assert out_l.shape == (B_large, ACTION_DIM)
    ref_l_bf16 = actor_reference_bf16(state_l, params, MAX_ACTION)
    ref_l_f32 = actor_reference_f32(state_l, params, MAX_ACTION)
    assert jnp.allclose(out_l, ref_l_bf16, atol=1e-2, rtol=1e-2), "mismatch vs bf16 reference"
    assert jnp.allclose(out_l, ref_l_f32, atol=1e-1, rtol=1e-1), "mismatch vs f32 reference"

    print("KERNEL_OK")
</pallas_src>

<mosaic_0001>
module attributes {stable_mosaic.version = 11 : i64} {
  func.func @actor_kernel(%arg0: i32, %arg1: memref<8x16xf32, #tpu.memory_space<vmem>>, %arg2: memref<16x256xbf16, #tpu.memory_space<vmem>>, %arg3: memref<1x256xf32, #tpu.memory_space<vmem>>, %arg4: memref<256x256xbf16, #tpu.memory_space<vmem>>, %arg5: memref<1x256xf32, #tpu.memory_space<vmem>>, %arg6: memref<256x4xbf16, #tpu.memory_space<vmem>>, %arg7: memref<1x4xf32, #tpu.memory_space<vmem>>, %arg8: memref<8x4xf32, #tpu.memory_space<vmem>>) attributes {dimension_semantics = [#tpu.dimension_semantics<parallel>], iteration_bounds = array<i64: 1>, scalar_prefetch = 0 : i64, scratch_operands = 0 : i64, tpu.core_type = #tpu.core_type<tc>, window_params = [{transform_indices = @transform_0, window_bounds = array<i64: 8, 16>}, {pipeline_mode = #tpu.pipeline_mode<synchronous>, transform_indices = @transform_1, window_bounds = array<i64: 16, 256>}, {pipeline_mode = #tpu.pipeline_mode<synchronous>, transform_indices = @transform_2, window_bounds = array<i64: 1, 256>}, {pipeline_mode = #tpu.pipeline_mode<synchronous>, transform_indices = @transform_3, window_bounds = array<i64: 256, 256>}, {pipeline_mode = #tpu.pipeline_mode<synchronous>, transform_indices = @transform_4, window_bounds = array<i64: 1, 256>}, {pipeline_mode = #tpu.pipeline_mode<synchronous>, transform_indices = @transform_5, window_bounds = array<i64: 256, 4>}, {pipeline_mode = #tpu.pipeline_mode<synchronous>, transform_indices = @transform_6, window_bounds = array<i64: 1, 4>}, {transform_indices = @transform_7, window_bounds = array<i64: 8, 4>}]} {
    %c0 = arith.constant 0 : index
    %c0_0 = arith.constant 0 : index
    %0 = vector.load %arg1[%c0, %c0_0] : memref<8x16xf32, #tpu.memory_space<vmem>>, vector<8x16xf32>
    %1 = arith.truncf %0 : vector<8x16xf32> to vector<8x16xbf16>
    %c0_1 = arith.constant 0 : index
    %c0_2 = arith.constant 0 : index
    %2 = vector.load %arg2[%c0_1, %c0_2] : memref<16x256xbf16, #tpu.memory_space<vmem>>, vector<16x256xbf16>
    %cst = arith.constant dense<0.000000e+00> : vector<8x256xf32>
    %3 = tpu.matmul %1, %2, %cst {dimension_numbers = #tpu.dot_dimension_numbers<[1], [0], [0], [1], [0, 0, 1, 1], [], []>} : vector<8x16xbf16>, vector<16x256xbf16>, vector<8x256xf32> -> vector<8x256xf32>
    %c0_3 = arith.constant 0 : index
    %c0_4 = arith.constant 0 : index
    %4 = vector.load %arg3[%c0_3, %c0_4] : memref<1x256xf32, #tpu.memory_space<vmem>>, vector<1x256xf32>
    %5 = vector.broadcast %4 : vector<1x256xf32> to vector<8x256xf32>
    %6 = arith.addf %3, %5 : vector<8x256xf32>
    %cst_5 = arith.constant 0.000000e+00 : f32
    %7 = vector.broadcast %cst_5 : f32 to vector<8x256xf32>
    %8 = arith.maximumf %6, %7 : vector<8x256xf32>
    %9 = arith.truncf %8 : vector<8x256xf32> to vector<8x256xbf16>
    %c0_6 = arith.constant 0 : index
    %c0_7 = arith.constant 0 : index
    %10 = vector.load %arg4[%c0_6, %c0_7] : memref<256x256xbf16, #tpu.memory_space<vmem>>, vector<256x256xbf16>
    %cst_8 = arith.constant dense<0.000000e+00> : vector<8x256xf32>
    %11 = tpu.matmul %9, %10, %cst_8 {dimension_numbers = #tpu.dot_dimension_numbers<[1], [0], [0], [1], [0, 0, 1, 1], [], []>} : vector<8x256xbf16>, vector<256x256xbf16>, vector<8x256xf32> -> vector<8x256xf32>
    %c0_9 = arith.constant 0 : index
    %c0_10 = arith.constant 0 : index
    %12 = vector.load %arg5[%c0_9, %c0_10] : memref<1x256xf32, #tpu.memory_space<vmem>>, vector<1x256xf32>
    %13 = vector.broadcast %12 : vector<1x256xf32> to vector<8x256xf32>
    %14 = arith.addf %11, %13 : vector<8x256xf32>
    %cst_11 = arith.constant 0.000000e+00 : f32
    %15 = vector.broadcast %cst_11 : f32 to vector<8x256xf32>
    %16 = arith.maximumf %14, %15 : vector<8x256xf32>
    %17 = arith.truncf %16 : vector<8x256xf32> to vector<8x256xbf16>
    %c0_12 = arith.constant 0 : index
    %c0_13 = arith.constant 0 : index
    %18 = vector.load %arg6[%c0_12, %c0_13] : memref<256x4xbf16, #tpu.memory_space<vmem>>, vector<256x4xbf16>
    %cst_14 = arith.constant dense<0.000000e+00> : vector<8x4xf32>
    %19 = tpu.matmul %17, %18, %cst_14 {dimension_numbers = #tpu.dot_dimension_numbers<[1], [0], [0], [1], [0, 0, 1, 1], [], []>} : vector<8x256xbf16>, vector<256x4xbf16>, vector<8x4xf32> -> vector<8x4xf32>
    %c0_15 = arith.constant 0 : index
    %c0_16 = arith.constant 0 : index
    %20 = vector.load %arg7[%c0_15, %c0_16] : memref<1x4xf32, #tpu.memory_space<vmem>>, vector<1x4xf32>
    %21 = vector.broadcast %20 : vector<1x4xf32> to vector<8x4xf32>
    %22 = arith.addf %19, %21 : vector<8x4xf32>
    %23 = math.tanh %22 : vector<8x4xf32>
    %cst_17 = arith.constant 2.000000e+00 : f32
    %24 = vector.broadcast %cst_17 : f32 to vector<8x4xf32>
    %25 = arith.mulf %24, %23 : vector<8x4xf32>
    %c0_18 = arith.constant 0 : index
    %c0_19 = arith.constant 0 : index
    %26 = vector.load %arg8[%c0_18, %c0_19] : memref<8x4xf32, #tpu.memory_space<vmem>>, vector<8x4xf32>
    tpu.vector_store %arg8[%c0_18, %c0_19], %25 {strides = array<i32>} : memref<8x4xf32, #tpu.memory_space<vmem>>, vector<8x4xf32>,
    return
  }
  func.func @transform_0(%arg0: i32) -> (i32, i32) {
    %c0_i32 = arith.constant 0 : i32
    %c0_i32_0 = arith.constant 0 : i32
    return %arg0, %c0_i32 : i32, i32
  }
  func.func @transform_1(%arg0: i32) -> (i32, i32) {
    %c0_i32 = arith.constant 0 : i32
    %c0_i32_0 = arith.constant 0 : i32
    %c0_i32_1 = arith.constant 0 : i32
    return %c0_i32, %c0_i32_0 : i32, i32
  }
  func.func @transform_2(%arg0: i32) -> (i32, i32) {
    %c0_i32 = arith.constant 0 : i32
    %c0_i32_0 = arith.constant 0 : i32
    %c0_i32_1 = arith.constant 0 : i32
    return %c0_i32, %c0_i32_0 : i32, i32
  }
  func.func @transform_3(%arg0: i32) -> (i32, i32) {
    %c0_i32 = arith.constant 0 : i32
    %c0_i32_0 = arith.constant 0 : i32
    %c0_i32_1 = arith.constant 0 : i32
    return %c0_i32, %c0_i32_0 : i32, i32
  }
  func.func @transform_4(%arg0: i32) -> (i32, i32) {
    %c0_i32 = arith.constant 0 : i32
    %c0_i32_0 = arith.constant 0 : i32
    %c0_i32_1 = arith.constant 0 : i32
    return %c0_i32, %c0_i32_0 : i32, i32
  }
  func.func @transform_5(%arg0: i32) -> (i32, i32) {
    %c0_i32 = arith.constant 0 : i32
    %c0_i32_0 = arith.constant 0 : i32
    %c0_i32_1 = arith.constant 0 : i32
    return %c0_i32, %c0_i32_0 : i32, i32
  }
  func.func @transform_6(%arg0: i32) -> (i32, i32) {
    %c0_i32 = arith.constant 0 : i32
    %c0_i32_0 = arith.constant 0 : i32
    %c0_i32_1 = arith.constant 0 : i32
    return %c0_i32, %c0_i32_0 : i32, i32
  }
  func.func @transform_7(%arg0: i32) -> (i32, i32) {
    %c0_i32 = arith.constant 0 : i32
    %c0_i32_0 = arith.constant 0 : i32
    return %arg0, %c0_i32 : i32, i32
  }
}

</mosaic_0001>

<bundles_post_ra>
// kernel: actor_forward.1
= control target key start
LH: loop header
LB: loop body
LE: loop exit
PB: predicated region body
PF: predicated region fallthrough
CT: control target
= control target key end

     0   :  { %12 = vsyncpa [#allocation3], 0  ;;  %s720_s24 = smov [#allocation2]   ;;  %s845_s0 = inlined_call_operand.vmem [shape: f32[8,16], index: 0, kind: input, shape index: {}]   ;;  %s846_s1 = inlined_call_operand.vmem [shape: bf16[16,256], index: 1, kind: input, shape index: {}]   ;;  %s847_s2 = inlined_call_operand.vmem [shape: f32[1,256], index: 2, kind: input, shape index: {}]   ;;  %s848_s3 = inlined_call_operand.hbm [shape: bf16[256,256], index: 3, kind: input, shape index: {}]   ;;  %s849_s4 = inlined_call_operand.vmem [shape: f32[1,256], index: 4, kind: input, shape index: {}]   ;;  %s850_s5 = inlined_call_operand.vmem [shape: bf16[256,4], index: 5, kind: input, shape index: {}]   ;;  %s851_s6 = inlined_call_operand.vmem [shape: f32[1,4], index: 6, kind: input, shape index: {}]   ;;  %s852_s7 = inlined_call_operand.vmem [shape: f32[8,4], index: 7, kind: output, shape index: {}]  }
   0x1   :  { %s24_s25 = sshll.u32 %s720_s24, 4  ;;  %s696_s28 = scalar_lea.hbm %s848_s3, 4096  ;;  %s25_s25 = int_to_ptr.vmem [resolvable:$true] %s24_s25 }
   0x2   :  { %p697_p0 = scmp.ne.s32.totalorder %s848_s3, %s696_s28  ;;  %p700_p1 = scmp.lt.u32.totalorder %s696_s28, %s848_s3 }
   0x4   :  { %p702_p2 = pnand %p700_p1, %p697_p0 }
   0x6   :  { %705 = shalt.err (!%p702_p2)
}
   0x7   :  { %s706_s10 = scalar_lea.vmem %s25_s25, 4096  ;;  %p711_p4 = scmp.lt.s32.totalorder %s25_s25, %s25_s25 }
   0x8   :  { %p707_p3 = scmp.ne.s32.totalorder %s25_s25, %s706_s10  ;;  %p712_p5 = scmp.lt.s32.totalorder %s706_s10, %s706_s10 }
   0xa   :  { %p713_p6 = por %p712_p5, %p711_p4 }
   0xc   :  { %p714_p7 = pnand %p713_p6, %p707_p3 }
   0xe   :  { %717 = shalt.err (!%p714_p7)
}
   0xf   :  { %s721_s11 = smov 128   ;;  %s722_s12 = smov 8  }
  0x10   :  { %30 = dma.hbm_to_vmem [thread:$0]  %s848_s3, 4096, %s25_s25, [#allocation3], %s721_s11, %s721_s11, %s722_s12  }
  0x11   :  { %718 = dma.done.wait [#allocation3], 4096  }
  0x12   :  { %719 = vsyncadd [#allocation3], 4294963200  ;;  %v723_v0 = vmov 0   ;;  %v627_v1 = vld [vmem:[%s846_s1 + $0x4] ss:$8 sps:$4 sm:$0xff]   ;;  %vm67_vm0 = vcmask 130048   ;;  %v47_v49 = vlaneseq }
  0x13   :  { %103 = vmatprep.mubr.bf16.mxu0 %v723_v0  ;;  %v629_v2 = vld [vmem:[%s846_s1] ss:$8 sps:$4 sm:$0xff]   ;;  %71 = vmatprep.subr.bf16.mxu0 %v627_v1  ;;  %v630_v5 = vld [vmem:[#allocation2 + $0x4] ss:$8 sps:$4 sm:$0xff]   ;;  %v633_v7 = vld [vmem:[#allocation2 + $0x14] ss:$8 sps:$4 sm:$0xff]  }
  0x14   :  { %v41_v3 = vld [vmem:[%s845_s0] sm:$0xff]  ;;  %72 = vmatpush1.bf16.msra.mxu0 %v629_v2  ;;  %320 = vmatprep.subr.bf16.mxu1 %v630_v5  ;;  %v635_v8 = vld [vmem:[#allocation2 + $0x10] ss:$8 sps:$4 sm:$0xff]   ;;  %v639_v11 = vld [vmem:[#allocation2 + $0x34] ss:$8 sps:$4 sm:$0xff]   ;;  %v48_v50 = vshrl.u32 %v47_v49, 7 }
  0x15   :  { %v42_v4 = vpack.c.bf16 %v41_v3, %v41_v3  ;;  %v632_v6 = vld [vmem:[#allocation2] ss:$8 sps:$4 sm:$0xff]   ;;  %v636_v9 = vld [vmem:[#allocation2 + $0x24] ss:$8 sps:$4 sm:$0xff]   ;;  %v641_v12 = vld [vmem:[#allocation2 + $0x30] ss:$8 sps:$4 sm:$0xff]  }
  0x16   :  { %321 = vmatpush1.bf16.msra.mxu1 %v632_v6  ;;  %v638_v10 = vld [vmem:[#allocation2 + $0x20] ss:$8 sps:$4 sm:$0xff]   ;;  %v642_v13 = vld [vmem:[#allocation2 + $0x44] ss:$8 sps:$4 sm:$0xff]   ;;  %v645_v15 = vld [vmem:[#allocation2 + $0x54] ss:$8 sps:$4 sm:$0xff]  }
  0x17   :  { %551 = vmatmul.mubr.msk.bf16.vlgmr.msra.gmra.mrb[0].mxu0 %vm67_vm0, %v42_v4  ;;  %322 = vmatprep.subr.bf16.mxu1 %v633_v7  ;;  %v644_v14 = vld [vmem:[#allocation2 + $0x40] ss:$8 sps:$4 sm:$0xff]   ;;  %v647_v16 = vld [vmem:[#allocation2 + $0x50] ss:$8 sps:$4 sm:$0xff]   ;;  %v648_v17 = vld [vmem:[#allocation2 + $0x64] ss:$8 sps:$4 sm:$0xff]  }
  0x18   :  { %v650_v18 = vld [vmem:[#allocation2 + $0x60] ss:$8 sps:$4 sm:$0xff]   ;;  %v651_v19 = vld [vmem:[#allocation2 + $0x74] ss:$8 sps:$4 sm:$0xff]   ;;  %v653_v20 = vld [vmem:[#allocation2 + $0x70] ss:$8 sps:$4 sm:$0xff]  }
  0x19   :  { %v654_v21 = vld [vmem:[#allocation2 + $0x84] ss:$8 sps:$4 sm:$0xff]   ;;  %v656_v22 = vld [vmem:[#allocation2 + $0x80] ss:$8 sps:$4 sm:$0xff]   ;;  %v657_v23 = vld [vmem:[#allocation2 + $0x94] ss:$8 sps:$4 sm:$0xff]  }
  0x1a   :  { %323 = vmatpush1.bf16.msra.mxu1 %v635_v8  ;;  %v659_v24 = vld [vmem:[#allocation2 + $0x90] ss:$8 sps:$4 sm:$0xff]   ;;  %v660_v25 = vld [vmem:[#allocation2 + $0xa4] ss:$8 sps:$4 sm:$0xff]   ;;  %v662_v26 = vld [vmem:[#allocation2 + $0xa0] ss:$8 sps:$4 sm:$0xff]  }
  0x1b   :  { %324 = vmatprep.subr.bf16.mxu1 %v636_v9  ;;  %v663_v27 = vld [vmem:[#allocation2 + $0xb4] ss:$8 sps:$4 sm:$0xff]   ;;  %v665_v28 = vld [vmem:[#allocation2 + $0xb0] ss:$8 sps:$4 sm:$0xff]   ;;  %v666_v29 = vld [vmem:[#allocation2 + $0xc4] ss:$8 sps:$4 sm:$0xff]  }
  0x1c   :  { %v668_v30 = vld [vmem:[#allocation2 + $0xc0] ss:$8 sps:$4 sm:$0xff]   ;;  %v669_v31 = vld [vmem:[#allocation2 + $0xd4] ss:$8 sps:$4 sm:$0xff]   ;;  %v671_v32 = vld [vmem:[#allocation2 + $0xd0] ss:$8 sps:$4 sm:$0xff]  }
  0x1d   :  { %v672_v33 = vld [vmem:[#allocation2 + $0xe4] ss:$8 sps:$4 sm:$0xff]   ;;  %v674_v34 = vld [vmem:[#allocation2 + $0xe0] ss:$8 sps:$4 sm:$0xff]   ;;  %v675_v35 = vld [vmem:[#allocation2 + $0xf4] ss:$8 sps:$4 sm:$0xff]  }
  0x1e   :  { %325 = vmatpush1.bf16.msra.mxu1 %v638_v10  ;;  %v677_v36 = vld [vmem:[#allocation2 + $0xf0] ss:$8 sps:$4 sm:$0xff]   ;;  %v678_v37 = vld [vmem:[%s850_s5 + $0x40] sm:$0xff]   ;;  %v680_v39 = vld [vmem:[%s850_s5 + $0x48] sm:$0xff]   ;;  %v49_v51 = vsub.s32 0, %v48_v50  ;;  %v53_v53 = vsub.s32 1, %v48_v50 }
  0x1f   :  { %326 = vmatprep.subr.bf16.mxu1 %v639_v11  ;;  %v679_v38 = vld [vmem:[%s850_s5] sm:$0xff]   ;;  %601 = vmatprep.subr.bf16.mxu0 %v678_v37  ;;  %v681_v40 = vld [vmem:[%s850_s5 + $0x8] sm:$0xff]   ;;  %v682_v41 = vld [vmem:[%s850_s5 + $0x50] sm:$0xff]   ;;  %vm542_vm1 = vcmask 31744  }
  0x20   :  { %602 = vmatpush3.bf16.msra.mxu0 %v679_v38  ;;  %v683_v42 = vld [vmem:[%s850_s5 + $0x10] sm:$0xff]   ;;  %v684_v43 = vld [vmem:[%s850_s5 + $0x58] sm:$0xff]   ;;  %v686_v45 = vld [vmem:[%s850_s5 + $0x60] sm:$0xff]  }
  0x21   :  { %603 = vmatprep.subr.bf16.mxu0 %v680_v39  ;;  %v685_v44 = vld [vmem:[%s850_s5 + $0x18] sm:$0xff]   ;;  %v687_v46 = vld [vmem:[%s850_s5 + $0x20] sm:$0xff]   ;;  %v688_v47 = vld [vmem:[%s850_s5 + $0x68] sm:$0xff]  }
  0x22   :  { %327 = vmatpush1.bf16.msra.mxu1 %v641_v12  ;;  %v689_v48 = vld [vmem:[%s850_s5 + $0x28] sm:$0xff]   ;;  %v45_v52 = vld [vmem:[%s847_s2] sm:$0x3]  ;;  %v690_v2 = vld [vmem:[%s850_s5 + $0x70] sm:$0xff]  }
  0x23   :  { %328 = vmatprep.subr.bf16.mxu1 %v642_v13  ;;  %v50_v54 = vrot.slane %v45_v52, %v49_v51  ;;  %v54_v55 = vrot.slane %v45_v52, %v53_v53  ;;  %v691_v3 = vld [vmem:[%s850_s5 + $0x30] sm:$0xff]   ;;  %v692_v4 = vld [vmem:[%s850_s5 + $0x78] sm:$0xff]   ;;  %v148_v6 = vld [vmem:[%s849_s4] sm:$0x3] }
  0x24   :  { %604 = vmatpush3.bf16.msra.mxu0 %v681_v40  ;;  %v693_v5 = vld [vmem:[%s850_s5 + $0x38] sm:$0xff]   ;;  %v153_v7 = vrot.slane %v148_v6, %v49_v51  ;;  %v157_v8 = vrot.slane %v148_v6, %v53_v53 }
  0x25   :  { %605 = vmatprep.subr.bf16.mxu0 %v682_v41 }
  0x26   :  { %329 = vmatpush1.bf16.msra.mxu1 %v644_v14 }
  0x27   :  { %330 = vmatprep.subr.bf16.mxu1 %v645_v15 }
  0x28   :  { %606 = vmatpush3.bf16.msra.mxu0 %v683_v42 }
  0x29   :  { %607 = vmatprep.subr.bf16.mxu0 %v684_v43 }
  0x2a   :  { %331 = vmatpush1.bf16.msra.mxu1 %v647_v16 }
  0x2b   :  { %332 = vmatprep.subr.bf16.mxu1 %v648_v17 }
  0x2c   :  { %608 = vmatpush3.bf16.msra.mxu0 %v685_v44 }
  0x2d   :  { %609 = vmatprep.subr.bf16.mxu0 %v686_v45 }
  0x2e   :  { %333 = vmatpush1.bf16.msra.mxu1 %v650_v18 }
  0x2f   :  { %334 = vmatprep.subr.bf16.mxu1 %v651_v19 }
  0x30   :  { %610 = vmatpush3.bf16.msra.mxu0 %v687_v46 }
  0x31   :  { %611 = vmatprep.subr.bf16.mxu0 %v688_v47 }
  0x32   :  { %335 = vmatpush1.bf16.msra.mxu1 %v653_v20  ;;  %v584_v20 = vld [vmem:[%s851_s6] ss:$0 sm:$0xff] }
  0x33   :  { %336 = vmatprep.subr.bf16.mxu1 %v654_v21 }
  0x34   :  { %612 = vmatpush3.bf16.msra.mxu0 %v689_v48 }
  0x35   :  { %613 = vmatprep.subr.bf16.mxu0 %v690_v2 }
  0x36   :  { %337 = vmatpush1.bf16.msra.mxu1 %v656_v22 }
  0x37   :  { %338 = vmatprep.subr.bf16.mxu1 %v657_v23 }
  0x38   :  { %614 = vmatpush3.bf16.msra.mxu0 %v691_v3 }
  0x39   :  { %615 = vmatprep.subr.bf16.mxu0 %v692_v4 }
  0x3a   :  { %339 = vmatpush1.bf16.msra.mxu1 %v659_v24 }
  0x3b   :  { %340 = vmatprep.subr.bf16.mxu1 %v660_v25 }
  0x3c   :  { %616 = vmatpush3.bf16.msra.mxu0 %v693_v5 }
  0x3e   :  { %341 = vmatpush1.bf16.msra.mxu1 %v662_v26 }
  0x3f   :  { %342 = vmatprep.subr.bf16.mxu1 %v663_v27 }
  0x42   :  { %343 = vmatpush1.bf16.msra.mxu1 %v665_v28 }
  0x43   :  { %344 = vmatprep.subr.bf16.mxu1 %v666_v29 }
  0x46   :  { %345 = vmatpush1.bf16.msra.mxu1 %v668_v30 }
  0x47   :  { %346 = vmatprep.subr.bf16.mxu1 %v669_v31 }
  0x4a   :  { %347 = vmatpush1.bf16.msra.mxu1 %v671_v32 }
  0x4b   :  { %348 = vmatprep.subr.bf16.mxu1 %v672_v33 }
  0x4e   :  { %349 = vmatpush1.bf16.msra.mxu1 %v674_v34 }
  0x4f   :  { %350 = vmatprep.subr.bf16.mxu1 %v675_v35 }
  0x52   :  { %351 = vmatpush1.bf16.msra.mxu1 %v677_v36 }
  0xea   :  { %v105_v56 = vpop.f32.mrb[0].mxu0 }
  0xeb   :  { %v106_v57 = vadd.f32 %v105_v56, %v50_v54  ;;  %v107_v58 = vpop.f32.mrb[1].mxu0 }
  0xec   :  { %v108_v59 = vadd.f32 %v107_v58, %v54_v55  ;;  %v109_v60 = vpop.f32.mrb[2].mxu0 }
  0xed   :  { %v112_v61 = vmax.f32 %v106_v57, 0.0  ;;  %v110_v62 = vpop.f32.mrb[3].mxu0 }
  0xee   :  { %v113_v63 = vmax.f32 %v108_v59, 0.0 }
  0xef   :  { %v114_v1 = vpack.c.bf16 %v112_v61, %v112_v61 }
  0xf0   :  { %v115_v0 = vpack.c.bf16 %v113_v63, %v113_v63 }
  0xf2   :  { %352 = vmatprep.mubr.bf16.mxu1 %v115_v0 }
  0xf3   :  { %353 = vmatmul.mubr.bf16.vlgmr.msra.gmra.mrb[0].mxu1 %v114_v1 }
 0x1c6   :  { %v354_v9 = vpop.f32.mrb[0].mxu1 }
 0x1c7   :  { %v355_v10 = vadd.f32 %v354_v9, %v153_v7  ;;  %v356_v11 = vpop.f32.mrb[1].mxu1 }
 0x1c8   :  { %v357_v12 = vadd.f32 %v356_v11, %v157_v8  ;;  %v358_v13 = vpop.f32.mrb[2].mxu1 }
 0x1c9   :  { %v361_v14 = vmax.f32 %v355_v10, 0.0  ;;  %v359_v15 = vpop.f32.mrb[3].mxu1 }
 0x1ca   :  { %v362_v16 = vmax.f32 %v357_v12, 0.0 }
 0x1cb   :  { %v363_v18 = vpack.c.bf16 %v361_v14, %v361_v14 }
 0x1cc   :  { %v364_v17 = vpack.c.bf16 %v362_v16, %v362_v16 }
 0x1ce   :  { %532 = vmatprep.mubr.bf16.mxu0 %v364_v17 }
 0x1cf   :  { %533 = vmatmul.mubr.bf16.vlgmr.msra.gmra.mrb[4].mxu0 %v363_v18 }
 0x2a2   :  { %v617_v19 = vpop.f32.mrb[4].mxu0 }
 0x2a3   :  { %v618_v21 = vpop.f32.mrb[5].mxu0 }
 0x2a4   :  { %v619_v22 = vadd.f32 %v618_v21, %v617_v19  ;;  %v620_v23 = vpop.f32.mrb[6].mxu0 }
 0x2a5   :  { %v621_v24 = vpop.f32.mrb[7].mxu0 }
 0x2a6   :  { %v535_v25 = vadd.f32 %v619_v22, %v584_v20 }
 0x2a8   :  { %694 = vtanh.f32 %v535_v25 }
 0x2b2   :  { %v695_v26 = vpop.eup %694 }
 0x2b3   :  { %v541_v27 = vmul.f32 2.0, %v695_v26 }
 0x2b5   :  { %543 = vst.msk [vmem:[%s852_s7] sm:$0xff] %vm542_vm1, %v541_v27 }
 0x2b6   :  { %548 = vsyncpa [#allocation3], 1 }

</bundles_post_ra>
